<compile_context>
chip_gen: v7x
topology: tpu7x:2x2x1
jax: 0.10.0
libtpu: 0.0.40
codegen_flags: <defaults>
</compile_context>

<pallas_src>
import functools

import jax
import jax.numpy as jnp
from jax.experimental import pallas as pl
from jax.experimental.pallas import tpu as pltpu

ALPHA = 0.999        # EmaModel default
_LANE = 128          # TPU lane width
_EMA_BLOCK_ROWS = 256  # (256, 128) f32 block = 128 KiB per operand


# ----------------------------------------------------------------------------
# Parameter <-> fused slab plumbing (Python-side glue, runs once per step)
# ----------------------------------------------------------------------------
def _build_meta(params, block_rows):
    """Layout metadata: (name, shape, size, offset) + padded total element count."""
    meta = []
    offset = 0
    for name in sorted(params):
        p = params[name]
        size = int(p.size)
        meta.append((name, tuple(p.shape), size, offset))
        offset += size
    chunk = block_rows * _LANE
    total = ((offset + chunk - 1) // chunk) * chunk
    return meta, total


def _flatten(params, meta, total, dtype):
    """Concatenate all parameters into one lane-dense [rows, 128] slab."""
    parts = [jnp.ravel(params[name]).astype(dtype) for name, _, _, _ in meta]
    flat = jnp.concatenate(parts)
    flat = jnp.pad(flat, (0, total - flat.shape[0]))
    return flat.reshape(total // _LANE, _LANE)


# ----------------------------------------------------------------------------
# Kernel 1: fused EMA parameter update (elementwise, VPU, HBM-bandwidth bound)
#   p_ema_new = p_model * alpha + p_ema * (1 - alpha)
# ----------------------------------------------------------------------------
def _ema_kernel(model_ref, ema_ref, out_ref, *, alpha):
    out_ref[...] = (model_ref[...] * alpha
                    + ema_ref[...] * (1.0 - alpha)).astype(out_ref.dtype)


def _make_ema_update(alpha, block_rows):
    kernel = functools.partial(_ema_kernel, alpha=alpha)

    def update(model_flat, ema_flat):
        rows, lanes = ema_flat.shape
        spec = pl.BlockSpec((block_rows, lanes), lambda i: (i, 0))
        return pl.pallas_call(
            kernel,
            out_shape=jax.ShapeDtypeStruct(ema_flat.shape, ema_flat.dtype),
            grid=(rows // block_rows,),
            in_specs=[spec, spec],
            out_specs=spec,
            input_output_aliases={1: 0},       # ema slab updated in place
            compiler_params=pltpu.CompilerParams(
                dimension_semantics=("parallel",)),
        )(model_flat, ema_flat)

    # Donate the old EMA slab so XLA can honor the in-place alias.
    return jax.jit(update, donate_argnums=(1,))


# ----------------------------------------------------------------------------
# Kernel 2: inner-model forward (nn.Linear): y = x @ W.T + b   (tiled MXU matmul)
#   x: [B, IN], w: [OUT, IN] (PyTorch layout), b: [1, OUT]
# ----------------------------------------------------------------------------
def _linear_kernel(x_ref, w_ref, b_ref, o_ref, acc_ref):
    k = pl.program_id(2)

    @pl.when(k == 0)
    def _init():
        acc_ref[...] = jnp.zeros_like(acc_ref)

    # Contract the K axis of x [tm, tk] against the K axis of w [tn, tk]
    # directly on the MXU -- no .T / XLU transpose, no VMEM temp.
    acc_ref[...] += jax.lax.dot_general(
        x_ref[...], w_ref[...],
        dimension_numbers=(((1,), (1,)), ((), ())),
        preferred_element_type=jnp.float32)

    @pl.when(k == pl.num_programs(2) - 1)
    def _finalize():
        # Bias added once, in the finalize branch only.
        o_ref[...] = (acc_ref[...] + b_ref[...]).astype(o_ref.dtype)


def linear_forward(x, w, b, *, tm=None, tn=None, tk=None):
    B, IN = x.shape
    OUT, IN2 = w.shape
    assert IN == IN2
    b2 = b.reshape(1, OUT)

    # Generation-safe defaults: lane/MXU aligned, small VMEM footprint.
    tm = tm or min(B, 128)
    tn = tn or min(OUT, 256)
    tk = tk or min(IN, 256)
    assert B % tm == 0 and OUT % tn == 0 and IN % tk == 0

    return pl.pallas_call(
        _linear_kernel,
        out_shape=jax.ShapeDtypeStruct((B, OUT), x.dtype),
        grid_spec=pltpu.PrefetchScalarGridSpec(
            num_scalar_prefetch=0,
            grid=(B // tm, OUT // tn, IN // tk),
            in_specs=[
                pl.BlockSpec((tm, tk), lambda i, j, k: (i, k)),   # x
                pl.BlockSpec((tn, tk), lambda i, j, k: (j, k)),   # w (PyTorch [out, in])
                pl.BlockSpec((1, tn), lambda i, j, k: (0, j)),    # bias
            ],
            out_specs=pl.BlockSpec((tm, tn), lambda i, j, k: (i, j)),
            scratch_shapes=[pltpu.VMEM((tm, tn), jnp.float32)],
        ),
        compiler_params=pltpu.CompilerParams(
            dimension_semantics=("parallel", "parallel", "arbitrary")),
    )(x, w, b2)


# ----------------------------------------------------------------------------
# EmaModel wrapper (Python glue mirroring the nn.Module semantics)
# ----------------------------------------------------------------------------
class EmaModelPallas:
    def __init__(self, params, alpha=ALPHA, block_rows=_EMA_BLOCK_ROWS):
        self.alpha = float(alpha)
        self.dtype = params["weight"].dtype
        self.meta, self.total = _build_meta(params, block_rows)
        # deepcopy(model): snapshot the parameters into the fused EMA slab.
        self.flat = _flatten(params, self.meta, self.total, self.dtype)
        self._update_fn = _make_ema_update(self.alpha, block_rows)

    def update(self, model_params):
        # named_parameters() iteration is fused into a single slab + one kernel.
        model_flat = _flatten(model_params, self.meta, self.total, self.dtype)
        self.flat = self._update_fn(model_flat, self.flat)

    def parameters(self):
        flat = self.flat.reshape(-1)
        return {name: flat[off:off + size].reshape(shape)
                for name, shape, size, off in self.meta}

    def __call__(self, x):
        p = self.parameters()
        return linear_forward(x, p["weight"], p["bias"])


if __name__ == "__main__":
    B, HIDDEN = 8, 128   # lane-dense demo shapes (last dim = 128)

    key = jax.random.PRNGKey(0)
    k_w, k_b, k_wm, k_bm, k_x = jax.random.split(key, 5)

    # Initial (deep-copied) parameters held by the EMA model.
    init_params = {
        "weight": 0.1 * jax.random.normal(k_w, (HIDDEN, HIDDEN), jnp.float32),
        "bias":   0.1 * jax.random.normal(k_b, (HIDDEN,), jnp.float32),
    }
    # "Live" model parameters after some training steps.
    model_params = {
        "weight": 0.1 * jax.random.normal(k_wm, (HIDDEN, HIDDEN), jnp.float32),
        "bias":   0.1 * jax.random.normal(k_bm, (HIDDEN,), jnp.float32),
    }
    x = jax.random.normal(k_x, (B, HIDDEN), jnp.float32)

    ema = EmaModelPallas(init_params, alpha=ALPHA)

    # One EMA update step (single fused, aliased Pallas kernel).
    ema.update(model_params)

    # Forward pass through the EMA model (tiled Pallas matmul kernel).
    y = jax.block_until_ready(ema(x))

    # References in plain JAX (same convention as the PyTorch source:
    # p = model_p * alpha + ema_p * (1 - alpha)).
    w_ref = model_params["weight"] * ALPHA + init_params["weight"] * (1.0 - ALPHA)
    b_ref = model_params["bias"] * ALPHA + init_params["bias"] * (1.0 - ALPHA)
    y_ref = x @ w_ref.T + b_ref[None, :]

    ema_now = ema.parameters()
    assert jnp.allclose(ema_now["weight"], w_ref, atol=1e-6, rtol=1e-6)
    assert jnp.allclose(ema_now["bias"], b_ref, atol=1e-6, rtol=1e-6)
    assert y.shape == (B, HIDDEN)
    assert jnp.allclose(y, y_ref, atol=5e-4, rtol=5e-4)

    print("KERNEL_OK")
</pallas_src>

<mosaic_0001>
module attributes {stable_mosaic.version = 11 : i64} {
  func.func @_ema_kernel(%arg0: i32, %arg1: memref<256x128xf32, #tpu.memory_space<vmem>>, %arg2: memref<256x128xf32, #tpu.memory_space<vmem>>, %arg3: memref<256x128xf32, #tpu.memory_space<vmem>>) attributes {dimension_semantics = [#tpu.dimension_semantics<parallel>], iteration_bounds = array<i64: 1>, scalar_prefetch = 0 : i64, scratch_operands = 0 : i64, tpu.core_type = #tpu.core_type<tc>, window_params = [{transform_indices = @transform_0, window_bounds = array<i64: 256, 128>}, {transform_indices = @transform_1, window_bounds = array<i64: 256, 128>}, {transform_indices = @transform_2, window_bounds = array<i64: 256, 128>}]} {
    %c0 = arith.constant 0 : index
    %c0_0 = arith.constant 0 : index
    %0 = vector.load %arg1[%c0, %c0_0] : memref<256x128xf32, #tpu.memory_space<vmem>>, vector<256x128xf32>
    %cst = arith.constant 9.990000e-01 : f32
    %1 = vector.broadcast %cst : f32 to vector<256x128xf32>
    %2 = arith.mulf %0, %1 : vector<256x128xf32>
    %c0_1 = arith.constant 0 : index
    %c0_2 = arith.constant 0 : index
    %3 = vector.load %arg2[%c0_1, %c0_2] : memref<256x128xf32, #tpu.memory_space<vmem>>, vector<256x128xf32>
    %cst_3 = arith.constant 1.000000e-03 : f32
    %4 = vector.broadcast %cst_3 : f32 to vector<256x128xf32>
    %5 = arith.mulf %3, %4 : vector<256x128xf32>
    %6 = arith.addf %2, %5 : vector<256x128xf32>
    %c0_4 = arith.constant 0 : index
    %c0_5 = arith.constant 0 : index
    %7 = vector.load %arg3[%c0_4, %c0_5] : memref<256x128xf32, #tpu.memory_space<vmem>>, vector<256x128xf32>
    tpu.vector_store %arg3[%c0_4, %c0_5], %6 {strides = array<i32>} : memref<256x128xf32, #tpu.memory_space<vmem>>, vector<256x128xf32>,
    return
  }
  func.func @transform_0(%arg0: i32) -> (i32, i32) {
    %c0_i32 = arith.constant 0 : i32
    %c0_i32_0 = arith.constant 0 : i32
    return %arg0, %c0_i32 : i32, i32
  }
  func.func @transform_1(%arg0: i32) -> (i32, i32) {
    %c0_i32 = arith.constant 0 : i32
    %c0_i32_0 = arith.constant 0 : i32
    return %arg0, %c0_i32 : i32, i32
  }
  func.func @transform_2(%arg0: i32) -> (i32, i32) {
    %c0_i32 = arith.constant 0 : i32
    %c0_i32_0 = arith.constant 0 : i32
    return %arg0, %c0_i32 : i32, i32
  }
}

</mosaic_0001>

<bundles_post_ra>
// kernel: update.1
= control target key start
LH: loop header
LB: loop body
LE: loop exit
PB: predicated region body
PF: predicated region fallthrough
CT: control target
= control target key end

     0   :  { %7 = vsyncpa [#allocation3], 0  ;;  %s392_s0 = inlined_call_operand.hbm [shape: f32[256,128], index: 0, kind: input, shape index: {}]   ;;  %s393_s1 = inlined_call_operand.hbm [shape: f32[256,128], index: 1, kind: input, shape index: {}, may-alias: {1,2}]   ;;  %s394_s2 = inlined_call_operand.hbm [shape: f32[256,128], index: 2, kind: output, shape index: {}, may-alias: {1,2}]  }
   0x1   :  { %8 = vsyncpa [#allocation6], 0 }
   0x2   :  { %9 = vsyncpa [#allocation4], 0  ;;  %s327_s9 = smov [#allocation2]   ;;  %s255_s13 = scalar_lea.hbm %s392_s0, 4096 }
   0x3   :  { %s15_s10 = sshll.u32 %s327_s9, 4  ;;  %p256_p0 = scmp.ne.s32.totalorder %s392_s0, %s255_s13  ;;  %s16_s10 = int_to_ptr.vmem [resolvable:$true] %s15_s10 }
   0x4   :  { %p259_p1 = scmp.lt.u32.totalorder %s255_s13, %s392_s0 }
   0x6   :  { %p261_p2 = pnand %p259_p1, %p256_p0 }
   0x8   :  { %264 = shalt.err (!%p261_p2)
}
   0x9   :  { %s265_s18 = scalar_lea.vmem %s16_s10, 4096  ;;  %p270_p4 = scmp.lt.s32.totalorder %s16_s10, %s16_s10 }
   0xa   :  { %p266_p3 = scmp.ne.s32.totalorder %s16_s10, %s265_s18  ;;  %p271_p5 = scmp.lt.s32.totalorder %s265_s18, %s265_s18 }
   0xc   :  { %p272_p6 = por %p271_p5, %p270_p4 }
   0xe   :  { %p273_p7 = pnand %p272_p6, %p266_p3 }
  0x10   :  { %276 = shalt.err (!%p273_p7)
}
  0x11   :  { %s328_s19 = smov 128   ;;  %s329_s20 = smov 8  }
  0x12   :  { %21 = dma.hbm_to_vmem [thread:$0]  %s392_s0, 4096, %s16_s10, [#allocation3], %s328_s19, %s328_s19, %s329_s20  }
  0x13   :  { %s330_s23 = smov [#allocation5]   ;;  %s277_s27 = scalar_lea.hbm %s393_s1, 4096 }
  0x14   :  { %s27_s24 = sshll.u32 %s330_s23, 4  ;;  %p278_p8 = scmp.ne.s32.totalorder %s393_s1, %s277_s27  ;;  %s28_s24 = int_to_ptr.vmem [resolvable:$true] %s27_s24 }
  0x15   :  { %p281_p9 = scmp.lt.u32.totalorder %s277_s27, %s393_s1 }
  0x17   :  { %p283_p10 = pnand %p281_p9, %p278_p8 }
  0x19   :  { %286 = shalt.err (!%p283_p10)
}
  0x1a   :  { %s287_s4 = scalar_lea.vmem %s28_s24, 4096  ;;  %p292_p12 = scmp.lt.s32.totalorder %s28_s24, %s28_s24 }
  0x1b   :  { %p288_p11 = scmp.ne.s32.totalorder %s28_s24, %s287_s4  ;;  %p293_p13 = scmp.lt.s32.totalorder %s287_s4, %s287_s4 }
  0x1d   :  { %p294_p0 = por %p293_p13, %p292_p12 }
  0x1f   :  { %p295_p1 = pnand %p294_p0, %p288_p11 }
  0x21   :  { %298 = shalt.err (!%p295_p1)
}
  0x22   :  { %33 = dma.hbm_to_vmem [thread:$0]  %s393_s1, 4096, %s28_s24, [#allocation6], %s328_s19, %s328_s19, %s329_s20  }
  0x23   :  { %321 = dma.done.wait [#allocation3], 4096  }
  0x24   :  { %322 = vsyncadd [#allocation3], 4294963200 }
  0x25   :  { %323 = dma.done.wait [#allocation6], 4096  }
  0x26   :  { %324 = vsyncadd [#allocation6], 4294963200  ;;  %v40_v0 = vld [vmem:[#allocation2] sm:$0xff]  ;;  %v41_v2 = vld [vmem:[#allocation2 + $0x8] sm:$0xff]  ;;  %s331_s1 = smov [#allocation7]  }
  0x27   :  { %v104_v1 = vld [vmem:[#allocation5] sm:$0xff]  ;;  %v72_v3 = vmul.f32 0.999, %v40_v0  ;;  %v73_v5 = vmul.f32 0.999, %v41_v2  ;;  %v105_v6 = vld [vmem:[#allocation5 + $0x8] sm:$0xff] }
  0x28   :  { %v136_v4 = vmul.f32 0.001, %v104_v1  ;;  %v42_v7 = vld [vmem:[#allocation2 + $0x10] sm:$0xff]  ;;  %v137_v10 = vmul.f32 0.001, %v105_v6  ;;  %v43_v13 = vld [vmem:[#allocation2 + $0x18] sm:$0xff] }
  0x29   :  { %v106_v8 = vld [vmem:[#allocation5 + $0x10] sm:$0xff]  ;;  %v74_v11 = vmul.f32 0.999, %v42_v7  ;;  %v107_v14 = vld [vmem:[#allocation5 + $0x18] sm:$0xff]  ;;  %v44_v15 = vld [vmem:[#allocation2 + $0x20] sm:$0xff]  ;;  %s237_s6 = sshll.u32 %s331_s1, 4  ;;  %s238_s6 = int_to_ptr.vmem [resolvable:$true] %s237_s6 }
  0x2a   :  { %v168_v9 = vadd.f32 %v136_v4, %v72_v3  ;;  %v138_v12 = vmul.f32 0.001, %v106_v8  ;;  %v169_v16 = vadd.f32 %v137_v10, %v73_v5  ;;  %v75_v18 = vmul.f32 0.999, %v43_v13  ;;  %v108_v20 = vld [vmem:[#allocation5 + $0x20] sm:$0xff]  ;;  %v45_v21 = vld [vmem:[#allocation2 + $0x28] sm:$0xff]  ;;  %p304_p3 = scmp.lt.s32.totalorder %s238_s6, %s238_s6 }
  0x2b   :  { %v139_v19 = vmul.f32 0.001, %v107_v14  ;;  %v76_v22 = vmul.f32 0.999, %v44_v15  ;;  %v140_v23 = vmul.f32 0.001, %v108_v20 }
  0x2c   :  { %200 = vst [vmem:[#allocation7] sm:$0xff] %v168_v9  ;;  %v170_v17 = vadd.f32 %v138_v12, %v74_v11  ;;  %v77_v24 = vmul.f32 0.999, %v45_v21  ;;  %201 = vst [vmem:[#allocation7 + $0x8] sm:$0xff] %v169_v16  ;;  %v109_v26 = vld [vmem:[#allocation5 + $0x28] sm:$0xff]  ;;  %v46_v27 = vld [vmem:[#allocation2 + $0x30] sm:$0xff] }
  0x2d   :  { %v171_v25 = vadd.f32 %v139_v19, %v75_v18  ;;  %v110_v28 = vld [vmem:[#allocation5 + $0x30] sm:$0xff]  ;;  %v172_v29 = vadd.f32 %v140_v23, %v76_v22  ;;  %v141_v30 = vmul.f32 0.001, %v109_v26  ;;  %v78_v31 = vmul.f32 0.999, %v46_v27  ;;  %v47_v33 = vld [vmem:[#allocation2 + $0x38] sm:$0xff] }
  0x2e   :  { %202 = vst [vmem:[#allocation7 + $0x10] sm:$0xff] %v170_v17  ;;  %v142_v32 = vmul.f32 0.001, %v110_v28  ;;  %v111_v34 = vld [vmem:[#allocation5 + $0x38] sm:$0xff]  ;;  %v48_v35 = vld [vmem:[#allocation2 + $0x40] sm:$0xff]  ;;  %v49_v41 = vld [vmem:[#allocation2 + $0x48] sm:$0xff] }
  0x2f   :  { %203 = vst [vmem:[#allocation7 + $0x18] sm:$0xff] %v171_v25  ;;  %204 = vst [vmem:[#allocation7 + $0x20] sm:$0xff] %v172_v29  ;;  %v173_v36 = vadd.f32 %v141_v30, %v77_v24  ;;  %v79_v38 = vmul.f32 0.999, %v47_v33  ;;  %v143_v39 = vmul.f32 0.001, %v111_v34 }
  0x30   :  { %v174_v37 = vadd.f32 %v142_v32, %v78_v31  ;;  %v112_v40 = vld [vmem:[#allocation5 + $0x40] sm:$0xff]  ;;  %v80_v42 = vmul.f32 0.999, %v48_v35  ;;  %v81_v44 = vmul.f32 0.999, %v49_v41  ;;  %v113_v46 = vld [vmem:[#allocation5 + $0x48] sm:$0xff] }
  0x31   :  { %v144_v43 = vmul.f32 0.001, %v112_v40  ;;  %205 = vst [vmem:[#allocation7 + $0x28] sm:$0xff] %v173_v36  ;;  %v175_v45 = vadd.f32 %v143_v39, %v79_v38  ;;  %v50_v47 = vld [vmem:[#allocation2 + $0x50] sm:$0xff]  ;;  %v145_v50 = vmul.f32 0.001, %v113_v46 }
  0x32   :  { %206 = vst [vmem:[#allocation7 + $0x30] sm:$0xff] %v174_v37  ;;  %v114_v48 = vld [vmem:[#allocation5 + $0x50] sm:$0xff]  ;;  %v82_v51 = vmul.f32 0.999, %v50_v47  ;;  %v51_v53 = vld [vmem:[#allocation2 + $0x58] sm:$0xff]  ;;  %v52_v55 = vld [vmem:[#allocation2 + $0x60] sm:$0xff] }
  0x33   :  { %v176_v49 = vadd.f32 %v144_v43, %v80_v42  ;;  %v146_v52 = vmul.f32 0.001, %v114_v48  ;;  %207 = vst [vmem:[#allocation7 + $0x38] sm:$0xff] %v175_v45  ;;  %v115_v54 = vld [vmem:[#allocation5 + $0x58] sm:$0xff]  ;;  %v177_v56 = vadd.f32 %v145_v50, %v81_v44  ;;  %v83_v58 = vmul.f32 0.999, %v51_v53 }
  0x34   :  { %v147_v59 = vmul.f32 0.001, %v115_v54  ;;  %v116_v60 = vld [vmem:[#allocation5 + $0x60] sm:$0xff]  ;;  %v53_v61 = vld [vmem:[#allocation2 + $0x68] sm:$0xff]  ;;  %v84_v62 = vmul.f32 0.999, %v52_v55 }
  0x35   :  { %208 = vst [vmem:[#allocation7 + $0x40] sm:$0xff] %v176_v49  ;;  %v178_v57 = vadd.f32 %v146_v52, %v82_v51  ;;  %v148_v63 = vmul.f32 0.001, %v116_v60  ;;  %v85_v0 = vmul.f32 0.999, %v53_v61  ;;  %209 = vst [vmem:[#allocation7 + $0x48] sm:$0xff] %v177_v56 }
  0x36   :  { %v179_v1 = vadd.f32 %v147_v59, %v83_v58  ;;  %v117_v2 = vld [vmem:[#allocation5 + $0x68] sm:$0xff]  ;;  %v54_v3 = vld [vmem:[#allocation2 + $0x70] sm:$0xff]  ;;  %v55_v9 = vld [vmem:[#allocation2 + $0x78] sm:$0xff]  ;;  %s299_s7 = scalar_lea.vmem %s238_s6, 4096 }
  0x37   :  { %210 = vst [vmem:[#allocation7 + $0x50] sm:$0xff] %v178_v57  ;;  %v118_v4 = vld [vmem:[#allocation5 + $0x70] sm:$0xff]  ;;  %v180_v5 = vadd.f32 %v148_v63, %v84_v62  ;;  %v149_v6 = vmul.f32 0.001, %v117_v2  ;;  %v86_v7 = vmul.f32 0.999, %v54_v3  ;;  %p300_p2 = scmp.ne.s32.totalorder %s238_s6, %s299_s7  ;;  %p305_p4 = scmp.lt.s32.totalorder %s299_s7, %s299_s7 }
  0x38   :  { %v150_v8 = vmul.f32 0.001, %v118_v4  ;;  %211 = vst [vmem:[#allocation7 + $0x58] sm:$0xff] %v179_v1  ;;  %v119_v10 = vld [vmem:[#allocation5 + $0x78] sm:$0xff]  ;;  %v56_v11 = vld [vmem:[#allocation2 + $0x80] sm:$0xff]  ;;  %v57_v17 = vld [vmem:[#allocation2 + $0x88] sm:$0xff] }
  0x39   :  { %212 = vst [vmem:[#allocation7 + $0x60] sm:$0xff] %v180_v5  ;;  %v181_v12 = vadd.f32 %v149_v6, %v85_v0  ;;  %v87_v14 = vmul.f32 0.999, %v55_v9  ;;  %v151_v15 = vmul.f32 0.001, %v119_v10  ;;  %v120_v16 = vld [vmem:[#allocation5 + $0x80] sm:$0xff]  ;;  %p306_p5 = por %p305_p4, %p304_p3 }
  0x3a   :  { %v182_v13 = vadd.f32 %v150_v8, %v86_v7  ;;  %v88_v18 = vmul.f32 0.999, %v56_v11  ;;  %v152_v19 = vmul.f32 0.001, %v120_v16  ;;  %v89_v20 = vmul.f32 0.999, %v57_v17 }
  0x3b   :  { %213 = vst [vmem:[#allocation7 + $0x68] sm:$0xff] %v181_v12  ;;  %v183_v21 = vadd.f32 %v151_v15, %v87_v14  ;;  %v121_v22 = vld [vmem:[#allocation5 + $0x88] sm:$0xff]  ;;  %v58_v23 = vld [vmem:[#allocation2 + $0x90] sm:$0xff]  ;;  %v59_v29 = vld [vmem:[#allocation2 + $0x98] sm:$0xff]  ;;  %p307_p6 = pnand %p306_p5, %p300_p2 }
  0x3c   :  { %214 = vst [vmem:[#allocation7 + $0x70] sm:$0xff] %v182_v13  ;;  %v122_v24 = vld [vmem:[#allocation5 + $0x90] sm:$0xff]  ;;  %v184_v25 = vadd.f32 %v152_v19, %v88_v18  ;;  %v153_v26 = vmul.f32 0.001, %v121_v22  ;;  %v90_v27 = vmul.f32 0.999, %v58_v23 }
  0x3d   :  { %v154_v28 = vmul.f32 0.001, %v122_v24  ;;  %215 = vst [vmem:[#allocation7 + $0x78] sm:$0xff] %v183_v21  ;;  %v123_v30 = vld [vmem:[#allocation5 + $0x98] sm:$0xff]  ;;  %v60_v31 = vld [vmem:[#allocation2 + $0xa0] sm:$0xff]  ;;  %v61_v37 = vld [vmem:[#allocation2 + $0xa8] sm:$0xff] }
  0x3e   :  { %216 = vst [vmem:[#allocation7 + $0x80] sm:$0xff] %v184_v25  ;;  %v185_v32 = vadd.f32 %v153_v26, %v89_v20  ;;  %v91_v34 = vmul.f32 0.999, %v59_v29  ;;  %v155_v35 = vmul.f32 0.001, %v123_v30  ;;  %v124_v36 = vld [vmem:[#allocation5 + $0xa0] sm:$0xff] }
  0x3f   :  { %v186_v33 = vadd.f32 %v154_v28, %v90_v27  ;;  %v92_v38 = vmul.f32 0.999, %v60_v31  ;;  %v156_v39 = vmul.f32 0.001, %v124_v36  ;;  %v93_v40 = vmul.f32 0.999, %v61_v37 }
  0x40   :  { %217 = vst [vmem:[#allocation7 + $0x88] sm:$0xff] %v185_v32  ;;  %v187_v41 = vadd.f32 %v155_v35, %v91_v34  ;;  %v125_v42 = vld [vmem:[#allocation5 + $0xa8] sm:$0xff]  ;;  %v62_v43 = vld [vmem:[#allocation2 + $0xb0] sm:$0xff]  ;;  %v63_v49 = vld [vmem:[#allocation2 + $0xb8] sm:$0xff] }
  0x41   :  { %218 = vst [vmem:[#allocation7 + $0x90] sm:$0xff] %v186_v33  ;;  %v126_v44 = vld [vmem:[#allocation5 + $0xb0] sm:$0xff]  ;;  %v188_v45 = vadd.f32 %v156_v39, %v92_v38  ;;  %v157_v46 = vmul.f32 0.001, %v125_v42  ;;  %v94_v47 = vmul.f32 0.999, %v62_v43 }
  0x42   :  { %v158_v48 = vmul.f32 0.001, %v126_v44  ;;  %219 = vst [vmem:[#allocation7 + $0x98] sm:$0xff] %v187_v41  ;;  %v127_v50 = vld [vmem:[#allocation5 + $0xb8] sm:$0xff]  ;;  %v64_v51 = vld [vmem:[#allocation2 + $0xc0] sm:$0xff]  ;;  %v65_v57 = vld [vmem:[#allocation2 + $0xc8] sm:$0xff] }
  0x43   :  { %220 = vst [vmem:[#allocation7 + $0xa0] sm:$0xff] %v188_v45  ;;  %v189_v52 = vadd.f32 %v157_v46, %v93_v40  ;;  %v95_v54 = vmul.f32 0.999, %v63_v49  ;;  %v159_v55 = vmul.f32 0.001, %v127_v50  ;;  %v128_v56 = vld [vmem:[#allocation5 + $0xc0] sm:$0xff] }
  0x44   :  { %v190_v53 = vadd.f32 %v158_v48, %v94_v47  ;;  %v96_v58 = vmul.f32 0.999, %v64_v51  ;;  %v160_v59 = vmul.f32 0.001, %v128_v56  ;;  %v97_v60 = vmul.f32 0.999, %v65_v57 }
  0x45   :  { %221 = vst [vmem:[#allocation7 + $0xa8] sm:$0xff] %v189_v52  ;;  %v191_v61 = vadd.f32 %v159_v55, %v95_v54  ;;  %v129_v62 = vld [vmem:[#allocation5 + $0xc8] sm:$0xff]  ;;  %v66_v63 = vld [vmem:[#allocation2 + $0xd0] sm:$0xff]  ;;  %v67_v5 = vld [vmem:[#allocation2 + $0xd8] sm:$0xff] }
  0x46   :  { %222 = vst [vmem:[#allocation7 + $0xb0] sm:$0xff] %v190_v53  ;;  %v130_v0 = vld [vmem:[#allocation5 + $0xd0] sm:$0xff]  ;;  %v192_v1 = vadd.f32 %v160_v59, %v96_v58  ;;  %v161_v2 = vmul.f32 0.001, %v129_v62  ;;  %v98_v3 = vmul.f32 0.999, %v66_v63 }
  0x47   :  { %v162_v4 = vmul.f32 0.001, %v130_v0  ;;  %223 = vst [vmem:[#allocation7 + $0xb8] sm:$0xff] %v191_v61  ;;  %v131_v6 = vld [vmem:[#allocation5 + $0xd8] sm:$0xff]  ;;  %v68_v7 = vld [vmem:[#allocation2 + $0xe0] sm:$0xff]  ;;  %v69_v13 = vld [vmem:[#allocation2 + $0xe8] sm:$0xff] }
  0x48   :  { %224 = vst [vmem:[#allocation7 + $0xc0] sm:$0xff] %v192_v1  ;;  %v193_v8 = vadd.f32 %v161_v2, %v97_v60  ;;  %v99_v10 = vmul.f32 0.999, %v67_v5  ;;  %v163_v11 = vmul.f32 0.001, %v131_v6  ;;  %v132_v12 = vld [vmem:[#allocation5 + $0xe0] sm:$0xff] }
  0x49   :  { %v194_v9 = vadd.f32 %v162_v4, %v98_v3  ;;  %v100_v14 = vmul.f32 0.999, %v68_v7  ;;  %v164_v15 = vmul.f32 0.001, %v132_v12  ;;  %v101_v16 = vmul.f32 0.999, %v69_v13 }
  0x4a   :  { %225 = vst [vmem:[#allocation7 + $0xc8] sm:$0xff] %v193_v8  ;;  %v195_v17 = vadd.f32 %v163_v11, %v99_v10  ;;  %v133_v18 = vld [vmem:[#allocation5 + $0xe8] sm:$0xff]  ;;  %v70_v19 = vld [vmem:[#allocation2 + $0xf0] sm:$0xff]  ;;  %v71_v25 = vld [vmem:[#allocation2 + $0xf8] sm:$0xff] }
  0x4b   :  { %226 = vst [vmem:[#allocation7 + $0xd0] sm:$0xff] %v194_v9  ;;  %v134_v20 = vld [vmem:[#allocation5 + $0xf0] sm:$0xff]  ;;  %v196_v21 = vadd.f32 %v164_v15, %v100_v14  ;;  %v165_v22 = vmul.f32 0.001, %v133_v18  ;;  %v102_v23 = vmul.f32 0.999, %v70_v19 }
  0x4c   :  { %v166_v24 = vmul.f32 0.001, %v134_v20  ;;  %227 = vst [vmem:[#allocation7 + $0xd8] sm:$0xff] %v195_v17  ;;  %v135_v26 = vld [vmem:[#allocation5 + $0xf8] sm:$0xff]  ;;  %v103_v29 = vmul.f32 0.999, %v71_v25 }
  0x4d   :  { %228 = vst [vmem:[#allocation7 + $0xe0] sm:$0xff] %v196_v21  ;;  %v197_v27 = vadd.f32 %v165_v22, %v101_v16  ;;  %v167_v30 = vmul.f32 0.001, %v135_v26 }
  0x4e   :  { %v198_v28 = vadd.f32 %v166_v24, %v102_v23 }
  0x4f   :  { %229 = vst [vmem:[#allocation7 + $0xe8] sm:$0xff] %v197_v27  ;;  %v199_v31 = vadd.f32 %v167_v30, %v103_v29 }
  0x50   :  { %230 = vst [vmem:[#allocation7 + $0xf0] sm:$0xff] %v198_v28 }
  0x51   :  { %231 = vst [vmem:[#allocation7 + $0xf8] sm:$0xff] %v199_v31 }
  0x52   :  { %310 = shalt.err (!%p307_p6)
}
  0x53   :  { %s311_s10 = scalar_lea.hbm %s394_s2, 4096 }
  0x54   :  { %p312_p7 = scmp.ne.s32.totalorder %s394_s2, %s311_s10  ;;  %p315_p8 = scmp.lt.u32.totalorder %s311_s10, %s394_s2 }
  0x56   :  { %p317_p9 = pnand %p315_p8, %p312_p7 }
  0x58   :  { %320 = shalt.err (!%p317_p9)
}
  0x59   :  { %243 = dma.vmem_to_hbm [thread:$0]  %s238_s6, 4096, %s394_s2, [#allocation4], %s328_s19, %s328_s19, %s329_s20  }
  0x5a   :  { %325 = dma.done.wait [#allocation4], 4096  }
  0x5b   :  { %326 = vsyncadd [#allocation4], 4294963200 }
  0x5c   :  { %247 = vsyncpa [#allocation3], 1 }
  0x5d   :  { %248 = vsyncpa [#allocation6], 1 }
  0x5e   :  { %249 = vsyncpa [#allocation4], 1 }

</bundles_post_ra>
